<compile_context>
chip_gen: v7x
topology: tpu7x:2x2x1
jax: 0.10.0
libtpu: 0.0.40
codegen_flags: <defaults>
</compile_context>

<pallas_src>
import jax
import jax.numpy as jnp
from jax.experimental import pallas as pl
from jax.experimental.pallas import tpu as pltpu


def _gain_kernel(x_ref, w1t_ref, b1_ref, w2_ref, b2_ref, o_ref):
    """One block of Nb images per grid step.

    x_ref   : (Nb, C, HW) VMEM  -- channels on sublanes, flattened spatial on lanes
    w1t_ref : (C, Cmid)   VMEM  -- conv1 1x1 weight, stored transposed (in, out)
    b1_ref  : (1, Cmid)   VMEM  -- conv1 bias
    w2_ref  : (C, Cmid)   VMEM  -- conv2 1x1 weight, PyTorch (out, in) layout
    b2_ref  : (C, 1)      VMEM  -- conv2 bias
    o_ref   : (Nb, C, HW) VMEM
    """
    x = x_ref[...]                                               # (Nb, C, HW)
    hw = x.shape[2]

    # ---- AdaptiveAvgPool2d(1): mean over spatial (lane-axis reduce) ----
    pooled = jnp.sum(x.astype(jnp.float32), axis=2, keepdims=True) * (1.0 / hw)   # (Nb, C, 1)

    # ---- 1x1 conv #1 + ReLU: h[n,m] = relu(sum_c pooled[n,c] * w1t[c,m] + b1[m]) ----
    # Tiny MLP: broadcast-multiply + reduce on VPU/XLU (hidden in DMA slack); no padded MXU.
    h = jnp.sum(pooled * w1t_ref[...][None, :, :], axis=1) + b1_ref[...]           # (Nb, Cmid)
    h = jnp.maximum(h, 0.0)

    # ---- 1x1 conv #2 + Sigmoid: g[n,c] = sum_m h[n,m] * w2[c,m] + b2[c] ----
    g = jnp.sum(h[:, None, :] * w2_ref[...][None, :, :], axis=2, keepdims=True)    # (Nb, C, 1)
    g = g + b2_ref[...][None, :, :]

    # Residual folded in: x*gain + x == x*(gain + 1). Sigmoid goes to the EUP.
    scale = jax.nn.sigmoid(g) + 1.0                                                # (Nb, C, 1)

    # ---- out = x * scale (scale broadcasts along the lane axis) ----
    o_ref[...] = (x * scale).astype(o_ref.dtype)


def _choose_batch_block(n, per_image_bytes, target_step_bytes=4 << 20):
    """Pick Nb so each grid step moves a multi-MiB slab, but keep >= 2 steps when N > 1."""
    nb = int(min(n, max(1, target_step_bytes // max(per_image_bytes, 1))))
    if n > 1 and nb >= n:
        nb = pl.cdiv(n, 2)   # keep both v7x TensorCores busy on the "parallel" batch axis
    return nb


def gain_block_pallas(x_nchw, params, *, vmem_limit_bytes=48 * 1024 * 1024):
    """x_nchw: (N, C, H, W) -> (N, C, H, W); matches GainBlock.forward."""
    w1t, b1, w2, b2 = (params[k] for k in ('w1t', 'b1', 'w2', 'b2'))
    N, C, H, W = x_nchw.shape
    HW = H * W
    Cmid = w1t.shape[1]

    # Free view: native NCHW memory order, no transpose passes over HBM.
    x2 = x_nchw.reshape(N, C, HW)

    per_image_bytes = C * HW * x_nchw.dtype.itemsize
    Nb = _choose_batch_block(N, per_image_bytes)
    n_steps = pl.cdiv(N, Nb)
    # If Nb does not divide N, the trailing block's padded rows compute garbage in isolation
    # (no cross-image mixing) and their writes are dropped -- still correct.

    out = pl.pallas_call(
        _gain_kernel,
        out_shape=jax.ShapeDtypeStruct((N, C, HW), x_nchw.dtype),
        grid_spec=pltpu.PrefetchScalarGridSpec(
            num_scalar_prefetch=0,
            grid=(n_steps,),
            in_specs=[
                pl.BlockSpec((Nb, C, HW), lambda n: (n, 0, 0)),
                pl.BlockSpec((C, Cmid), lambda n: (0, 0)),
                pl.BlockSpec((1, Cmid), lambda n: (0, 0)),
                pl.BlockSpec((C, Cmid), lambda n: (0, 0)),
                pl.BlockSpec((C, 1), lambda n: (0, 0)),
            ],
            out_specs=pl.BlockSpec((Nb, C, HW), lambda n: (n, 0, 0)),
        ),
        compiler_params=pltpu.CompilerParams(
            dimension_semantics=("parallel",),        # batch axis shards across TCs (v7x)
            vmem_limit_bytes=vmem_limit_bytes,        # > v5e 16 MiB default, < v7x 64 MiB physical
        ),
    )(x2, w1t, b1, w2, b2)

    return out.reshape(N, C, H, W)


def make_params(key, in_dim, h_dim):
    """Deterministic init matching Conv2d(in_dim, h_dim//4, 1) / Conv2d(h_dim//4, h_dim, 1)."""
    cmid = h_dim // 4
    ks = jax.random.split(key, 4)
    # PyTorch conv1 weight is (cmid, in_dim, 1, 1); stored here transposed as (in_dim, cmid).
    w1t = jax.random.normal(ks[0], (in_dim, cmid), jnp.float32) * 0.2
    b1 = jax.random.normal(ks[1], (1, cmid), jnp.float32) * 0.1
    # PyTorch conv2 weight is (h_dim, cmid, 1, 1); kept in (out, in) layout.
    w2 = jax.random.normal(ks[2], (h_dim, cmid), jnp.float32) * 0.2
    b2 = jax.random.normal(ks[3], (h_dim, 1), jnp.float32) * 0.1
    return dict(w1t=w1t, b1=b1, w2=w2, b2=b2)


def gain_block_reference(x_nchw, params):
    """Pure-JAX reference for validation (matches the PyTorch forward)."""
    w1t, b1, w2, b2 = (params[k] for k in ('w1t', 'b1', 'w2', 'b2'))
    pooled = jnp.mean(x_nchw, axis=(2, 3))                  # (N, C)   == AdaptiveAvgPool2d(1)
    h = jnp.maximum(pooled @ w1t + b1[0], 0.0)              # (N, Cmid)
    g = h @ w2.T + b2[:, 0]                                 # (N, Cout)
    gain = jax.nn.sigmoid(g)
    return x_nchw * gain[:, :, None, None] + x_nchw


if __name__ == "__main__":
    key = jax.random.PRNGKey(0)
    k_x, k_p = jax.random.split(key)

    # in_dim == h_dim (required for the residual broadcast, as in the PyTorch module)
    N, C, H, W = 2, 32, 16, 16
    x = jax.random.normal(k_x, (N, C, H, W), jnp.float32)
    params = make_params(k_p, in_dim=C, h_dim=C)

    out = jax.block_until_ready(gain_block_pallas(x, params))
    ref = jax.block_until_ready(gain_block_reference(x, params))

    assert out.shape == (N, C, H, W)
    assert jnp.allclose(out, ref, atol=1e-4, rtol=1e-4), "mismatch vs reference"

    print("KERNEL_OK")
</pallas_src>

<mosaic_0001>
module attributes {stable_mosaic.version = 11 : i64} {
  func.func @_gain_kernel(%arg0: i32, %arg1: memref<1x32x256xf32, #tpu.memory_space<vmem>>, %arg2: memref<32x8xf32, #tpu.memory_space<vmem>>, %arg3: memref<1x8xf32, #tpu.memory_space<vmem>>, %arg4: memref<32x8xf32, #tpu.memory_space<vmem>>, %arg5: memref<32x1xf32, #tpu.memory_space<vmem>>, %arg6: memref<1x32x256xf32, #tpu.memory_space<vmem>>) attributes {dimension_semantics = [#tpu.dimension_semantics<parallel>], iteration_bounds = array<i64: 2>, scalar_prefetch = 0 : i64, scratch_operands = 0 : i64, tpu.core_type = #tpu.core_type<tc>, window_params = [{transform_indices = @transform_0, window_bounds = array<i64: 1, 32, 256>}, {pipeline_mode = #tpu.pipeline_mode<synchronous>, transform_indices = @transform_1, window_bounds = array<i64: 32, 8>}, {pipeline_mode = #tpu.pipeline_mode<synchronous>, transform_indices = @transform_2, window_bounds = array<i64: 1, 8>}, {pipeline_mode = #tpu.pipeline_mode<synchronous>, transform_indices = @transform_3, window_bounds = array<i64: 32, 8>}, {pipeline_mode = #tpu.pipeline_mode<synchronous>, transform_indices = @transform_4, window_bounds = array<i64: 32, 1>}, {transform_indices = @transform_5, window_bounds = array<i64: 1, 32, 256>}]} {
    %c0 = arith.constant 0 : index
    %c0_0 = arith.constant 0 : index
    %c0_1 = arith.constant 0 : index
    %0 = vector.load %arg1[%c0, %c0_0, %c0_1] : memref<1x32x256xf32, #tpu.memory_space<vmem>>, vector<1x32x256xf32>
    %cst = arith.constant dense<0.000000e+00> : vector<1x32xf32>
    %1 = vector.multi_reduction <add>, %0, %cst [2] : vector<1x32x256xf32> to vector<1x32xf32>
    %2 = vector.shape_cast %1 : vector<1x32xf32> to vector<1x32x1xf32>
    %cst_2 = arith.constant 3.906250e-03 : f32
    %3 = vector.broadcast %cst_2 : f32 to vector<1x32x1xf32>
    %4 = arith.mulf %2, %3 : vector<1x32x1xf32>
    %c0_3 = arith.constant 0 : index
    %c0_4 = arith.constant 0 : index
    %5 = vector.load %arg2[%c0_3, %c0_4] : memref<32x8xf32, #tpu.memory_space<vmem>>, vector<32x8xf32>
    %6 = vector.shape_cast %5 : vector<32x8xf32> to vector<1x32x8xf32>
    %7 = vector.broadcast %4 : vector<1x32x1xf32> to vector<1x32x8xf32>
    %8 = arith.mulf %7, %6 : vector<1x32x8xf32>
    %cst_5 = arith.constant dense<0.000000e+00> : vector<1x8xf32>
    %9 = vector.multi_reduction <add>, %8, %cst_5 [1] : vector<1x32x8xf32> to vector<1x8xf32>
    %c0_6 = arith.constant 0 : index
    %c0_7 = arith.constant 0 : index
    %10 = vector.load %arg3[%c0_6, %c0_7] : memref<1x8xf32, #tpu.memory_space<vmem>>, vector<1x8xf32>
    %11 = arith.addf %9, %10 : vector<1x8xf32>
    %cst_8 = arith.constant 0.000000e+00 : f32
    %12 = vector.broadcast %cst_8 : f32 to vector<1x8xf32>
    %13 = arith.maximumf %11, %12 : vector<1x8xf32>
    %14 = vector.shape_cast %13 : vector<1x8xf32> to vector<1x1x8xf32>
    %c0_9 = arith.constant 0 : index
    %c0_10 = arith.constant 0 : index
    %15 = vector.load %arg4[%c0_9, %c0_10] : memref<32x8xf32, #tpu.memory_space<vmem>>, vector<32x8xf32>
    %16 = vector.shape_cast %15 : vector<32x8xf32> to vector<1x32x8xf32>
    %17 = vector.broadcast %14 : vector<1x1x8xf32> to vector<1x32x8xf32>
    %18 = arith.mulf %17, %16 : vector<1x32x8xf32>
    %cst_11 = arith.constant dense<0.000000e+00> : vector<1x32xf32>
    %19 = vector.multi_reduction <add>, %18, %cst_11 [2] : vector<1x32x8xf32> to vector<1x32xf32>
    %20 = vector.shape_cast %19 : vector<1x32xf32> to vector<1x32x1xf32>
    %c0_12 = arith.constant 0 : index
    %c0_13 = arith.constant 0 : index
    %21 = vector.load %arg5[%c0_12, %c0_13] : memref<32x1xf32, #tpu.memory_space<vmem>>, vector<32x1xf32>
    %22 = vector.shape_cast %21 : vector<32x1xf32> to vector<1x32x1xf32>
    %23 = arith.addf %20, %22 : vector<1x32x1xf32>
    %24 = arith.negf %23 : vector<1x32x1xf32>
    %25 = math.exp %24 : vector<1x32x1xf32>
    %cst_14 = arith.constant 1.000000e+00 : f32
    %26 = vector.broadcast %cst_14 : f32 to vector<1x32x1xf32>
    %27 = arith.addf %26, %25 : vector<1x32x1xf32>
    %28 = arith.divf %26, %27 : vector<1x32x1xf32>
    %cst_15 = arith.constant 1.000000e+00 : f32
    %29 = vector.broadcast %cst_15 : f32 to vector<1x32x1xf32>
    %30 = arith.addf %28, %29 : vector<1x32x1xf32>
    %31 = vector.broadcast %30 : vector<1x32x1xf32> to vector<1x32x256xf32>
    %32 = arith.mulf %0, %31 : vector<1x32x256xf32>
    %c0_16 = arith.constant 0 : index
    %c0_17 = arith.constant 0 : index
    %c0_18 = arith.constant 0 : index
    %33 = vector.load %arg6[%c0_16, %c0_17, %c0_18] : memref<1x32x256xf32, #tpu.memory_space<vmem>>, vector<1x32x256xf32>
    tpu.vector_store %arg6[%c0_16, %c0_17, %c0_18], %32 {strides = array<i32>} : memref<1x32x256xf32, #tpu.memory_space<vmem>>, vector<1x32x256xf32>,
    return
  }
  func.func @transform_0(%arg0: i32) -> (i32, i32, i32) {
    %c0_i32 = arith.constant 0 : i32
    %c0_i32_0 = arith.constant 0 : i32
    %c0_i32_1 = arith.constant 0 : i32
    return %arg0, %c0_i32, %c0_i32_0 : i32, i32, i32
  }
  func.func @transform_1(%arg0: i32) -> (i32, i32) {
    %c0_i32 = arith.constant 0 : i32
    %c0_i32_0 = arith.constant 0 : i32
    %c0_i32_1 = arith.constant 0 : i32
    return %c0_i32, %c0_i32_0 : i32, i32
  }
  func.func @transform_2(%arg0: i32) -> (i32, i32) {
    %c0_i32 = arith.constant 0 : i32
    %c0_i32_0 = arith.constant 0 : i32
    %c0_i32_1 = arith.constant 0 : i32
    return %c0_i32, %c0_i32_0 : i32, i32
  }
  func.func @transform_3(%arg0: i32) -> (i32, i32) {
    %c0_i32 = arith.constant 0 : i32
    %c0_i32_0 = arith.constant 0 : i32
    %c0_i32_1 = arith.constant 0 : i32
    return %c0_i32, %c0_i32_0 : i32, i32
  }
  func.func @transform_4(%arg0: i32) -> (i32, i32) {
    %c0_i32 = arith.constant 0 : i32
    %c0_i32_0 = arith.constant 0 : i32
    %c0_i32_1 = arith.constant 0 : i32
    return %c0_i32, %c0_i32_0 : i32, i32
  }
  func.func @transform_5(%arg0: i32) -> (i32, i32, i32) {
    %c0_i32 = arith.constant 0 : i32
    %c0_i32_0 = arith.constant 0 : i32
    %c0_i32_1 = arith.constant 0 : i32
    return %arg0, %c0_i32, %c0_i32_0 : i32, i32, i32
  }
}

</mosaic_0001>

<bundles_post_ra>
// kernel: tpu_custom_call.1
= control target key start
LH: loop header
LB: loop body
LE: loop exit
PB: predicated region body
PF: predicated region fallthrough
CT: control target
= control target key end

     0   :  { %10 = vsyncpa [#allocation3], 0  ;;  %s944_s0 = inlined_call_operand.hbm [shape: f32[2,32,256], index: 0, kind: input, shape index: {}]   ;;  %s945_s1 = inlined_call_operand.vmem [shape: f32[32,8], index: 1, kind: input, shape index: {}]   ;;  %s946_s2 = inlined_call_operand.vmem [shape: f32[1,8], index: 2, kind: input, shape index: {}]   ;;  %s947_s3 = inlined_call_operand.vmem [shape: f32[32,8], index: 3, kind: input, shape index: {}]   ;;  %s948_s4 = inlined_call_operand.vmem [shape: f32[32,1], index: 4, kind: input, shape index: {}]   ;;  %s949_s5 = inlined_call_operand.hbm [shape: f32[2,32,256], index: 5, kind: output, shape index: {}]  }
   0x1   :  { %12 = vsyncpa [#allocation3 + $0x1], 0 }
   0x2   :  { %13 = vsyncpa [#allocation4], 0 }
   0x3   :  { %15 = vsyncpa [#allocation4 + $0x1], 0  ;;  %s699_s18 = smov 0   ;;  %s701_s19 = smov 0  }
   0x4   :  { %s703_s20 = smov 0   ;;  %s705_s21 = smov 0  }
   0x5 LB: > { %s720_s22 = sadd.s32 4294967295, %s660_s21   ;;  %s475_s23 = sadd.s32 4294967294, %s660_s21   ;;  %s660_s21 = sphi %s705_s21, %s962_s21   ;;  %s656_s20 = sphi %s703_s20, %s961_s20   ;;  %s652_s19 = sphi %s701_s19, %s960_s19   ;;  %s648_s18 = sphi %s699_s18, %s959_s18  }
   0x6   : > { %s724_s24 = sadd.s32 1, %s660_s21   ;;  %s28_s25 = sadd.s32 1, %s656_s20 }
   0x7   : > { %s25_s26 = ssub.s32 %s660_s21, %s724_s24  ;;  %p35_p0 = scmp.ne.s32.totalorder %s656_s20, %s652_s19 }
   0x8   : > { %p26_p1 = scmp.eq.s32.totalorder %s25_s26, 0  ;;  %p36_p2 = scmp.eq.s32.totalorder %s660_s21, 0 }
   0x9   : > { %p41_p3 = scmp.ne.s32.totalorder %s652_s19, %s648_s18  ;;  %p42_p4 = scmp.eq.s32.totalorder %s720_s22, 0 }
   0xa   : > { %s736_s27 = scalar_select %p26_p1, %s656_s20, %s28_s25  }
   0xb   : > { %p738_p5 = por %p36_p2, %p35_p0  ;;  %p742_p6 = por %p42_p4, %p41_p3 }
   0xc   : > { %p149_p7 = scmp.eq.s32.totalorder %s720_s22, 1  ;;  %p155_p8 = scmp.eq.s32.totalorder %s475_s23, 1 }
   0xd   : > { %p507_p10 = scmp.lt.s32.totalorder %s660_s21, 2  ;;  %s187_s7 = sand.u32 1, %s656_s20  }
   0xe   : > { %p749_p11 = por %p149_p7, %p35_p0  ;;  %p753_p12 = por %p155_p8, %p41_p3 }
   0xf   : > { %s493_s8 = sshll.u32 %s660_s21, 10  ;;  %s478_s9 = sshll.u32 %s187_s7, 6 }
  0x10   : > { %s953_s30 = scalar_select %p749_p11, 1, 0 }
  0x11   : > { %s954_s6 = scalar_select %p753_p12, 1, 0 }
  0x12   : > { %s762_s12 = scalar_lea.hbm %s944_s0, %s493_s8  ;;  %s191_s13 = scalar_lea.vmem [#allocation2], %s478_s9 }
  0x13   : > { %s198_s14 = sshll.u32 %s191_s13, 4  ;;  %p766_p13 = pnand %p507_p10, %p738_p5  ;;  %s770_s14 = int_to_ptr.vmem [resolvable:$true] %s198_s14 }
  0x14   : > { %s772_s16 = scalar_lea.sflag [#allocation3], %s187_s7  ;;  %s564_s17 = scalar_lea.hbm %s762_s12, 1024 }
  0x15   : > { %p565_p0 = scmp.ne.s32.totalorder %s762_s12, %s564_s17  ;;  %p566_p1 = pneg %p766_p13 }
  0x16   : > { %s569_s26 = scalar_lea.hbm %s944_s0, 2048  ;;  %p570_p4 = scmp.lt.u32.totalorder %s762_s12, %s944_s0 }
  0x17   : > { %p567_p2 = pnand %p566_p1, %p565_p0  ;;  %p571_p5 = scmp.lt.u32.totalorder %s569_s26, %s564_s17 }
  0x18   : > { %p573_p8 = scmp.lt.u32.totalorder %s564_s17, %s762_s12 }
  0x19   : > { %p568_p3 = pneg %p567_p2  ;;  %p572_p7 = por %p571_p5, %p570_p4 }
  0x1b   : > { %p574_p10 = por %p573_p8, %p572_p7 }
  0x1d   : > { %p575_p9 = pnand %p574_p10, %p568_p3 }
  0x1f   : > { %578 = shalt.err (!%p575_p9)
}
  0x20   : > { %s579_s7 = scalar_lea.vmem %s770_s14, 1024  ;;  %s662_s9 = smov [#allocation2]  }
  0x21   : > { %p580_p0 = scmp.ne.s32.totalorder %s770_s14, %s579_s7  ;;  %s584_s10 = sshll.u32 %s662_s9, 4  ;;  %s585_s10 = int_to_ptr.vmem [resolvable:$false] %s584_s10 }
  0x22   : > { %s586_s11 = scalar_lea.vmem %s585_s10, 2048  ;;  %p587_p11 = scmp.lt.s32.totalorder %s770_s14, %s585_s10 }
  0x23   : > { %p582_p2 = pnand %p580_p0, %p566_p1  ;;  %p588_p4 = scmp.lt.s32.totalorder %s586_s11, %s579_s7 }
  0x25   : > { %p583_p12 = pneg %p582_p2  ;;  %p589_p5 = por %p588_p4, %p587_p11 }
  0x27   : > { %p590_p7 = pnand %p589_p5, %p583_p12 }
  0x29   : > { %593 = shalt.err (!%p590_p7)
}
  0x2a   : > { %s663_s13 = smov 256   ;;  %s664_s17 = smov 16  }
  0x2b   : > { %502 = dma.hbm_to_vmem [thread:$0]  (!%p766_p13), %s762_s12, 1024, %s770_s14, %s772_s16, %s663_s13, %s663_s13, %s664_s17  }
  0x2c   : > { %p481_p9 = scmp.ge.s32.totalorder %s660_s21, 1  ;;  %p206_p1 = scmp.lt.s32.totalorder %s660_s21, 3 }
  0x2e   : > { %p207_p3 = pnand %p481_p9, %p206_p1 }
  0x2f   : > { %s803_s23 = sand.u32 (!%p207_p3), 1, %s652_s19  }
  0x30   : > { %210 = sbr.rel (%p207_p3) target bundleno = 563 (0x233), region = 40  ;;  %s482_s25 = sshll.u32 (!%p207_p3), %s803_s23, 6 }
  0x31   : > { %s213_s26 = scalar_lea.sflag (!%p207_p3), [#allocation3], %s803_s23  ;;  %s216_s28 = scalar_lea.vmem (!%p207_p3), [#allocation2], %s482_s25 }
  0x37   : > { %639 = dma.done.wait (%p742_p6), %s213_s26, 1024  }
  0x38   : > { %641 = vsyncadd (%p742_p6), %s213_s26, 4294966272  ;;  %v813_v0 = vld [vmem:[%s216_s28] sm:$0xff]  ;;  %v815_v1 = vld [vmem:[%s216_s28 + $0x8] sm:$0xff]  ;;  %vm275_vm0 = vcmask 64512   ;;  %v296_v38 = vlaneseq  ;;  %v665_v60 = vmov 0   ;;  %s242_s26 = scalar_lea.vmem [#allocation5], %s482_s25 }
  0x39   : > { %v817_v2 = vld [vmem:[%s216_s28 + $0x20] sm:$0xff]  ;;  %v251_v3 = vadd.f32 %v815_v1, %v813_v0  ;;  %v821_v4 = vld [vmem:[%s216_s28 + $0x28] sm:$0xff]  ;;  %v823_v5 = vld [vmem:[%s216_s28 + $0x10] sm:$0xff]  ;;  %547 = vset.pattern.permute.xlu1 %v665_v60  ;;  %546 = vset.pattern.permute.xlu0 %v665_v60  ;;  %s494_s29 = sshll.u32 %s720_s22, 10  ;;  %s389_s22 = scalar_lea.sflag [#allocation4], %s803_s23 }
  0x3a   : > { %v825_v6 = vld [vmem:[%s216_s28 + $0x18] sm:$0xff]  ;;  %v257_v7 = vadd.f32 %v821_v4, %v817_v2  ;;  %v829_v8 = vld [vmem:[%s216_s28 + $0x30] sm:$0xff]  ;;  %v267_v15 = vld [vmem:[%s945_s1] sm:$0xff]  ;;  %v297_v41 = vshrl.u32 %v296_v38, 7  ;;  %s898_s14 = scalar_lea.hbm %s949_s5, %s494_s29  ;;  %p956_p11 = scmp.ne.s32.totalorder %s953_s30, 0 }
  0x3b   : > { %v831_v9 = vld [vmem:[%s216_s28 + $0x38] sm:$0xff]  ;;  %252 = vadd.xlane.f32.xlu0 %v251_v3  ;;  %v254_v10 = vadd.f32 %v825_v6, %v823_v5  ;;  %v269_v17 = vld [vmem:[%s945_s1 + $0x10] sm:$0xff]  ;;  %v268_v18 = vld [vmem:[%s945_s1 + $0x8] sm:$0xff]  ;;  %s402_s28 = sshll.u32 %s242_s26, 4  ;;  %s666_s16 = smov [#allocation5]   ;;  %s893_s28 = int_to_ptr.vmem [resolvable:$true] %s402_s28 }
  0x3c   : > { %258 = vadd.xlane.f32.xlu1 %v257_v7  ;;  %v260_v11 = vadd.f32 %v831_v9, %v829_v8  ;;  %v270_v22 = vld [vmem:[%s945_s1 + $0x18] sm:$0xff]  ;;  %v289_v42 = vld [vmem:[%s946_s2] sm:$0x1]  ;;  %v298_v45 = vsub.s32 0, %v297_v41  ;;  %v293_v47 = vld [vmem:[%s947_s3 + $0x8] sm:$0xff]  ;;  %s594_s15 = scalar_lea.vmem %s893_s28, 1024 }
  0x3d   : > { %v292_v48 = vld [vmem:[%s947_s3] sm:$0xff]  ;;  %v295_v50 = vld [vmem:[%s947_s3 + $0x18] sm:$0xff]  ;;  %v294_v51 = vld [vmem:[%s947_s3 + $0x10] sm:$0xff]  ;;  %p595_p6 = scmp.ne.s32.totalorder %s893_s28, %s594_s15  ;;  %s598_s8 = sshll.u32 %s666_s16, 4  ;;  %s599_s8 = int_to_ptr.vmem [resolvable:$false] %s598_s8 }
  0x3e   : > { %v317_v61 = vld [vmem:[%s948_s4 + $0x8] sm:$0xff]  ;;  %v316_v62 = vld [vmem:[%s948_s4] sm:$0xff]  ;;  %s600_s7 = scalar_lea.vmem %s599_s8, 2048  ;;  %p601_p8 = scmp.lt.s32.totalorder %s893_s28, %s599_s8 }
  0x3f   : > { %255 = vadd.xlane.f32.xlu0 %v254_v10  ;;  %p596_p12 = pnand %p595_p6, %p956_p11  ;;  %p602_p10 = scmp.lt.s32.totalorder %s600_s7, %s594_s15 }
  0x40   : > { %261 = vadd.xlane.f32.xlu1 %v260_v11  ;;  %v319_v11 = vld [vmem:[%s948_s4 + $0x18] sm:$0xff] }
  0x41   : > { %p597_p13 = pneg %p596_p12  ;;  %p603_p0 = por %p602_p10, %p601_p8 }
  0x43   : > { %p604_p2 = pnand %p603_p0, %p597_p13 }
  0xc8   : > { %v253_v12 = vpop.xlane.xlu0 %252 }
  0xc9   : > { %v263_v13 = vmul.f32 0.00390625, %v253_v12  ;;  %v259_v14 = vpop.xlane.xlu1 %258  ;;  %v318_v12 = vld [vmem:[%s948_s4 + $0x10] sm:$0xff] }
  0xca   : > { %v265_v16 = vmul.f32 0.00390625, %v259_v14 }
  0xcb   : > { %v271_v20 = vmul.f32 %v267_v15, %v263_v13 }
  0xcc   : > { %v256_v19 = vpop.xlane.xlu0 %255  ;;  %v273_v25 = vmul.f32 %v269_v17, %v265_v16 }
  0xcd   : > { %v264_v21 = vmul.f32 0.00390625, %v256_v19  ;;  %v262_v23 = vpop.xlane.xlu1 %261  ;;  %v276_v28 = vsel %vm275_vm0, %v271_v20, 0.0 }
  0xce   : > { %v266_v24 = vmul.f32 0.00390625, %v262_v23  ;;  %v279_v31 = vsel %vm275_vm0, %v273_v25, 0.0 }
  0xcf   : > { %v272_v26 = vmul.f32 %v268_v18, %v264_v21 }
  0xd0   : > { %v274_v27 = vmul.f32 %v270_v22, %v266_v24 }
  0xd1   : > { %v277_v29 = vsel %vm275_vm0, %v272_v26, 0.0 }
  0xd2   : > { %v278_v30 = vadd.f32 %v277_v29, %v276_v28  ;;  %v281_v32 = vsel %vm275_vm0, %v274_v27, 0.0 }
  0xd4   : > { %v280_v33 = vadd.f32 %v279_v31, %v278_v30 }
  0xd6   : > { %v282_v34 = vadd.f32 %v281_v32, %v280_v33 }
  0xd8   : > { %v283_v35 = vrot.slane %v282_v34, 4 }
  0xda   : > { %v284_v36 = vadd.f32 %v283_v35, %v282_v34 }
  0xdc   : > { %v285_v37 = vrot.slane %v284_v36, 2 }
  0xde   : > { %v286_v39 = vadd.f32 %v285_v37, %v284_v36 }
  0xe0   : > { %v287_v40 = vrot.slane %v286_v39, 1 }
  0xe2   : > { %v288_v43 = vadd.f32 %v287_v40, %v286_v39 }
  0xe4   : > { %v290_v44 = vadd.f32 %v289_v42, %v288_v43 }
  0xe6   : > { %v291_v46 = vmax.f32 %v290_v44, 0.0 }
  0xe8   : > { %v299_v49 = vrot.slane %v291_v46, %v298_v45 }
  0xea   : > { %v301_v52 = vmul.f32 %v299_v49, %v293_v47  ;;  %v300_v53 = vmul.f32 %v299_v49, %v292_v48  ;;  %v303_v56 = vmul.f32 %v299_v49, %v295_v50  ;;  %v302_v57 = vmul.f32 %v299_v49, %v294_v51 }
  0xec   : > { %v307_v54 = vsel %vm275_vm0, %v301_v52, 0.0  ;;  %v304_v55 = vsel %vm275_vm0, %v300_v53, 0.0  ;;  %v313_v58 = vsel %vm275_vm0, %v303_v56, 0.0  ;;  %v310_v59 = vsel %vm275_vm0, %v302_v57, 0.0 }
  0xed   : > { %308 = vadd.xlane.f32.xlu1 %v307_v54  ;;  %305 = vadd.xlane.f32.xlu0 %v304_v55 }
  0xf1   : > { %314 = vadd.xlane.f32.xlu1 %v313_v58  ;;  %311 = vadd.xlane.f32.xlu0 %v310_v59 }
 0x17a   : > { %v309_v63 = vpop.xlane.xlu1 %308  ;;  %v306_v3 = vpop.xlane.xlu0 %305 }
 0x17b   : > { %v321_v7 = vadd.f32 %v317_v61, %v309_v63  ;;  %v320_v10 = vadd.f32 %v316_v62, %v306_v3 }
 0x17d   : > { %v485_v13 = vmul.f32 -1.442695, %v321_v7  ;;  %v484_v14 = vmul.f32 -1.442695, %v320_v10 }
 0x17e   : > { %v315_v15 = vpop.xlane.xlu1 %314  ;;  %v312_v16 = vpop.xlane.xlu0 %311 }
 0x17f   : > { %548 = vpow2.f32 %v485_v13  ;;  %v323_v17 = vadd.f32 %v319_v11, %v315_v15  ;;  %v322_v18 = vadd.f32 %v318_v12, %v312_v16 }
 0x180   : > { %550 = vpow2.f32 %v484_v14 }
 0x181   : > { %v487_v19 = vmul.f32 -1.442695, %v323_v17  ;;  %v486_v20 = vmul.f32 -1.442695, %v322_v18 }
 0x183   : > { %552 = vpow2.f32 %v487_v19 }
 0x184   : > { %554 = vpow2.f32 %v486_v20 }
 0x189   : > { %v549_v21 = vpop.eup %548 }
 0x18a   : > { %v551_v22 = vpop.eup %550  ;;  %v337_v23 = vadd.f32 1.0, %v549_v21 }
 0x18b   : > { %v336_v24 = vadd.f32 1.0, %v551_v22 }
 0x18c   : > { %556 = vrcp.f32 %v337_v23 }
 0x18d   : > { %v553_v25 = vpop.eup %552  ;;  %558 = vrcp.f32 %v336_v24 }
 0x18e   : > { %v555_v26 = vpop.eup %554  ;;  %v339_v27 = vadd.f32 1.0, %v553_v25 }
 0x18f   : > { %v338_v28 = vadd.f32 1.0, %v555_v26 }
 0x191   : > { %560 = vrcp.f32 %v338_v28 }
 0x192   : > { %562 = vrcp.f32 %v339_v27 }
 0x196   : > { %v557_v29 = vpop.eup %556 }
 0x197   : > { %v559_v30 = vpop.eup %558  ;;  %v349_v31 = vadd.f32 1.0, %v557_v29 }
 0x198   : > { %v348_v32 = vadd.f32 1.0, %v559_v30 }
 0x199   : > { %359 = vperm.xlu1 %547, %v349_v31  }
 0x19a   : > { %354 = vperm.xlu0 %546, %v348_v32  }
 0x19b   : > { %v561_v33 = vpop.eup %560 }
 0x19c   : > { %v350_v34 = vadd.f32 1.0, %v561_v33  ;;  %v563_v35 = vpop.eup %562 }
 0x19d   : > { %v351_v36 = vadd.f32 1.0, %v563_v35 }
 0x19e   : > { %364 = vperm.xlu1 %547, %v350_v34  }
 0x1a2   : > { %369 = vperm.xlu1 %547, %v351_v36  }
 0x218   : > { %v360_v37 = vpop.permute.xlu1 %359 }
 0x219   : > { %v374_v38 = vmul.f32 %v360_v37, %v823_v5  ;;  %v375_v39 = vmul.f32 %v360_v37, %v825_v6  ;;  %v355_v40 = vpop.permute.xlu0 %354 }
 0x21a   : > { %v372_v41 = vmul.f32 %v355_v40, %v813_v0  ;;  %v373_v42 = vmul.f32 %v355_v40, %v815_v1 }
 0x21b   : > { %382 = vst [vmem:[%s242_s26 + $0x10] sm:$0xff] %v374_v38  ;;  %383 = vst [vmem:[%s242_s26 + $0x18] sm:$0xff] %v375_v39 }
 0x21c   : > { %380 = vst [vmem:[%s242_s26] sm:$0xff] %v372_v41  ;;  %381 = vst [vmem:[%s242_s26 + $0x8] sm:$0xff] %v373_v42 }
 0x21d   : > { %v365_v43 = vpop.permute.xlu1 %364 }
 0x21e   : > { %v376_v44 = vmul.f32 %v365_v43, %v817_v2  ;;  %v377_v5 = vmul.f32 %v365_v43, %v821_v4 }
 0x220   : > { %384 = vst [vmem:[%s242_s26 + $0x20] sm:$0xff] %v376_v44  ;;  %385 = vst [vmem:[%s242_s26 + $0x28] sm:$0xff] %v377_v5 }
 0x221   : > { %v370_v0 = vpop.permute.xlu1 %369 }
 0x222   : > { %v378_v1 = vmul.f32 %v370_v0, %v829_v8  ;;  %v379_v2 = vmul.f32 %v370_v0, %v831_v9 }
 0x224   : > { %386 = vst [vmem:[%s242_s26 + $0x30] sm:$0xff] %v378_v1  ;;  %387 = vst [vmem:[%s242_s26 + $0x38] sm:$0xff] %v379_v2 }
 0x225   : > { %607 = shalt.err (!%p604_p2)
}
 0x226   : > { %s608_s9 = scalar_lea.hbm %s898_s14, 1024  ;;  %s612_s13 = scalar_lea.hbm %s949_s5, 2048 }
 0x227   : > { %p609_p4 = scmp.ne.s32.totalorder %s898_s14, %s608_s9  ;;  %p613_p9 = scmp.lt.u32.totalorder %s898_s14, %s949_s5 }
 0x228   : > { %p614_p1 = scmp.lt.u32.totalorder %s612_s13, %s608_s9  ;;  %p616_p6 = scmp.lt.u32.totalorder %s608_s9, %s898_s14 }
 0x229   : > { %p610_p5 = pnand %p609_p4, %p956_p11 }
 0x22a   : > { %p615_p3 = por %p614_p1, %p613_p9 }
 0x22b   : > { %p611_p7 = pneg %p610_p5 }
 0x22c   : > { %p617_p12 = por %p616_p6, %p615_p3 }
 0x22e   : > { %p618_p13 = pnand %p617_p12, %p611_p7 }
 0x230   : > { %621 = shalt.err (!%p618_p13)
}
 0x231   : > { %s667_s29 = smov 256   ;;  %s668_s25 = smov 16  }
 0x232   : > { %497 = dma.vmem_to_hbm [thread:$0]  (%p956_p11), %s893_s28, 1024, %s898_s14, %s389_s22, %s667_s29, %s667_s29, %s668_s25  }
 0x233 PF: > { %s417_s12 = sand.u32 1, %s648_s18   ;;  %p957_p8 = scmp.ne.s32.totalorder %s954_s6, 0 }
 0x234   : > { %p958_p10 = scmp.ge.s32.totalorder %s660_s21, 2  ;;  %s418_s15 = scalar_lea.sflag [#allocation4], %s417_s12 }
 0x236   : > { %p504_p0 = pnand %p958_p10, %p957_p8 }
 0x238   : > { %643 = dma.done.wait (!%p504_p0), %s418_s15, 1024  }
 0x239   : > { %645 = vsyncadd (!%p504_p0), %s418_s15, 4294966272  ;;  %p18_p2 = scmp.ge.s32.totalorder %s724_s24, 4   ;;  %s959_s18 = smov %s652_s19 }
 0x23a   : > { %s960_s19 = smov %s656_s20  ;;  %s961_s20 = smov %s736_s27 }
 0x23b   : > { %s962_s21 = smov %s724_s24  ;;  %20 = sbr.rel (!%p18_p2) target bundleno = 5 (0x5), region = 85 }
 0x242   :  { %423 = vsyncpa [#allocation3], 1 }
 0x243   :  { %425 = vsyncpa [#allocation3 + $0x1], 1 }
 0x244   :  { %426 = vsyncpa [#allocation4], 1 }
 0x245   :  { %428 = vsyncpa [#allocation4 + $0x1], 1 }

</bundles_post_ra>
